<compile_context>
chip_gen: v7x
topology: tpu7x:2x2x1
jax: 0.10.0
libtpu: 0.0.40
codegen_flags: <defaults>
</compile_context>

<pallas_src>
import jax
import jax.numpy as jnp
from jax.experimental import pallas as pl
from jax.experimental.pallas import tpu as pltpu

LANE = 128
BF16_SUBLANE = 16            # native sublane pack of a bf16 vreg
MAX_TILE_B = 512             # measured large-tile regime (~85% HBM roofline)
VMEM_TILE_BUDGET = 40 << 20  # conservative per-core budget (v7x: 64 MiB/TC)


def _round_up(x, m):
    return (x + m - 1) // m * m


def augru_kernel(x_ref, ht_ref, score_ref, wx_ref, wh_ref, b_ref, out_ref):
    """One batch tile of the AUGRU cell.

    x_ref     [TB, I]    f32   input               (cast to bf16 for MXU)
    ht_ref    [TB, H]    f32   previous hidden     (bf16 for MXU, f32 blend)
    score_ref [TB, 1]    f32   attention score
    wx_ref    [I, 4*Hp]  bf16  [Wu | Wr | Wz | 0 ]
    wh_ref    [H, 4*Hp]  bf16  [Uu | Ur | 0  | Uz]
    b_ref     [1, 4*Hp]  f32   [bu | br | bh | 0 ]
    out_ref   [TB, H]
    """
    H = out_ref.shape[1]
    Hp = b_ref.shape[1] // 4
    cdt = wx_ref.dtype

    # Two fused MXU dots (f32 accumulation) replace the wrapper-side concat.
    pre = jnp.dot(x_ref[...].astype(cdt), wx_ref[...],
                  preferred_element_type=jnp.float32)
    pre = pre + jnp.dot(ht_ref[...].astype(cdt), wh_ref[...],
                        preferred_element_type=jnp.float32)
    pre = pre + b_ref[...]

    ht = ht_ref[...].astype(jnp.float32)
    a = score_ref[...].astype(jnp.float32)

    # Gate blocks start at 128-lane-aligned offsets (Hp % 128 == 0); all gate
    # elementwise math stays in f32 (v5e VPU/EUP have no bf16).
    u = a * jax.nn.sigmoid(pre[:, 0:H])                       # attentional update
    r = jax.nn.sigmoid(pre[:, Hp:Hp + H])                     # reset
    z = jnp.tanh(pre[:, 2 * Hp:2 * Hp + H]
                 + r * pre[:, 3 * Hp:3 * Hp + H])             # candidate

    # (1 - u) * ht + u * z  ==  ht + u * (z - ht)
    out_ref[...] = (ht + u * (z - ht)).astype(out_ref.dtype)


def prepare_augru_params(w, u, bu, br, bh, *, compute_dtype=jnp.bfloat16):
    """One-time repack of PyTorch-layout AUGRU params (outside the hot path).

    w: [3H, I], u: [3H, H], biases: [H]. The 3H axis is ordered (u, r, z),
    matching `i_x.chunk(3, dim=1)` in the PyTorch module.
    Returns (wx [I, 4*Hp], wh [H, 4*Hp]) in compute_dtype and bias [1, 4*Hp] f32.
    Gate column blocks: 0:pre_u, 1:pre_r, 2:i_z (+bh), 3:h_z (reset applied
    post-matmul inside the kernel).
    """
    _, I = w.shape
    H = u.shape[1]
    Hp = _round_up(max(H, LANE), LANE)

    wT = jnp.transpose(w).astype(jnp.float32)   # [I, 3H]
    uT = jnp.transpose(u).astype(jnp.float32)   # [H, 3H]

    wx = jnp.zeros((I, 4 * Hp), jnp.float32)
    wx = wx.at[:, 0:H].set(wT[:, 0:H])                       # update gate, x part
    wx = wx.at[:, Hp:Hp + H].set(wT[:, H:2 * H])             # reset gate,  x part
    wx = wx.at[:, 2 * Hp:2 * Hp + H].set(wT[:, 2 * H:3 * H])  # candidate i_z

    wh = jnp.zeros((H, 4 * Hp), jnp.float32)
    wh = wh.at[:, 0:H].set(uT[:, 0:H])                        # update gate, ht part
    wh = wh.at[:, Hp:Hp + H].set(uT[:, H:2 * H])              # reset gate,  ht part
    wh = wh.at[:, 3 * Hp:3 * Hp + H].set(uT[:, 2 * H:3 * H])  # candidate h_z

    bias = jnp.zeros((1, 4 * Hp), jnp.float32)
    bias = bias.at[0, 0:H].set(bu.astype(jnp.float32))
    bias = bias.at[0, Hp:Hp + H].set(br.astype(jnp.float32))
    # bh added to i_z before r*h_z -- algebraically identical to adding after.
    bias = bias.at[0, 2 * Hp:2 * Hp + H].set(bh.astype(jnp.float32))

    return wx.astype(compute_dtype), wh.astype(compute_dtype), bias


@jax.jit
def augru_forward(x, score, ht, wx, wh, bias):
    """x:[B,I] score:[B] ht:[B,H]; wx/wh/bias from prepare_augru_params."""
    B, I = x.shape
    H = ht.shape[1]
    fourHp = bias.shape[1]
    out_dtype = ht.dtype

    weight_bytes = (wx.size * wx.dtype.itemsize
                    + wh.size * wh.dtype.itemsize
                    + bias.size * bias.dtype.itemsize)

    def vmem_need(tb):
        act = 2 * tb * 4 * (I + H + 1 + H)   # double-buffered f32 x/ht/score/out streams
        pre = 4 * tb * fourHp                # f32 pre-activation intermediate
        return weight_bytes + act + pre

    # Batch tile: one tile rounded to the bf16 sublane pack (16, never 8) for
    # small B, 512-row tiles for large B; halve while over the VMEM budget so
    # v7x's 64 MiB/TC is never exceeded.
    tile_b = MAX_TILE_B if B > MAX_TILE_B else _round_up(B, BF16_SUBLANE)
    while tile_b > BF16_SUBLANE and vmem_need(tile_b) > VMEM_TILE_BUDGET:
        tile_b = _round_up(tile_b // 2, BF16_SUBLANE)
    Bp = _round_up(B, tile_b)

    if Bp != B:
        pad = Bp - B
        x = jnp.pad(x, ((0, pad), (0, 0)))
        ht_in = jnp.pad(ht, ((0, pad), (0, 0)))
        score = jnp.pad(score, ((0, pad),))
    else:
        ht_in = ht
    score2d = score.reshape(Bp, 1)

    # Explicit scoped-VMEM limit (v5e default 16 MiB, v6e/v7x 32 MiB); capped
    # at v7x's 64 MiB/TC physical.
    vmem_limit = int(min(64 << 20, max(32 << 20, 2 * vmem_need(tile_b) + (4 << 20))))

    # Resident (constant index_map) operands: single-buffer them when they are
    # VMEM-significant so v7x (one copy per core under "parallel") keeps room
    # for large batch tiles.
    def resident_spec(shape):
        if weight_bytes > (4 << 20):
            return pl.BlockSpec(shape, lambda b: (0, 0),
                                pipeline_mode=pl.Buffered(1))
        return pl.BlockSpec(shape, lambda b: (0, 0))

    cost = pl.CostEstimate(
        flops=2 * Bp * (I + H) * fourHp,
        transcendentals=3 * Bp * H,
        bytes_accessed=4 * Bp * (I + H + 1 + H) + weight_bytes,
    )

    out = pl.pallas_call(
        augru_kernel,
        out_shape=jax.ShapeDtypeStruct((Bp, H), out_dtype),
        grid_spec=pltpu.PrefetchScalarGridSpec(
            num_scalar_prefetch=0,
            grid=(Bp // tile_b,),
            in_specs=[
                pl.BlockSpec((tile_b, I), lambda b: (b, 0)),   # x      (streams)
                pl.BlockSpec((tile_b, H), lambda b: (b, 0)),   # ht     (streams)
                pl.BlockSpec((tile_b, 1), lambda b: (b, 0)),   # score  (streams)
                resident_spec((I, fourHp)),                    # Wx     (VMEM-resident)
                resident_spec((H, fourHp)),                    # Wh     (VMEM-resident)
                resident_spec((1, fourHp)),                    # bias   (VMEM-resident)
            ],
            out_specs=pl.BlockSpec((tile_b, H), lambda b: (b, 0)),
        ),
        compiler_params=pltpu.CompilerParams(
            dimension_semantics=("parallel",),
            vmem_limit_bytes=vmem_limit,
        ),
        cost_estimate=cost,
    )(x, ht_in, score2d, wx, wh, bias)

    return out[0:B] if Bp != B else out


def _xavier_normal(key, shape):
    fan_out, fan_in = shape
    std = (2.0 / (fan_in + fan_out)) ** 0.5
    return std * jax.random.normal(key, shape, dtype=jnp.float32)


def _reference(x, score, ht, w, u, bu, br, bh):
    i_x = x @ w.T
    h_x = ht @ u.T
    H = ht.shape[1]
    i_u, i_r, i_z = i_x[:, :H], i_x[:, H:2 * H], i_x[:, 2 * H:]
    h_u, h_r, h_z = h_x[:, :H], h_x[:, H:2 * H], h_x[:, 2 * H:]
    a = score[:, None]
    ug = a * jax.nn.sigmoid(i_u + h_u + bu)
    r = jax.nn.sigmoid(i_r + h_r + br)
    z = jnp.tanh(i_z + h_z * r + bh)
    return (1.0 - ug) * ht + ug * z


if __name__ == "__main__":
    B, I, H = 8, 16, 32

    key = jax.random.PRNGKey(0)
    k_w, k_u, k_bu, k_br, k_bh, k_x, k_h, k_s = jax.random.split(key, 8)

    # Deterministic parameter init (xavier_normal_ shapes from the module);
    # small nonzero biases so the fused-bias plumbing is actually exercised.
    w = _xavier_normal(k_w, (3 * H, I))
    u = _xavier_normal(k_u, (3 * H, H))
    bu = 0.1 * jax.random.normal(k_bu, (H,), dtype=jnp.float32)
    br = 0.1 * jax.random.normal(k_br, (H,), dtype=jnp.float32)
    bh = 0.1 * jax.random.normal(k_bh, (H,), dtype=jnp.float32)

    x = jax.random.normal(k_x, (B, I), dtype=jnp.float32)
    ht = jax.random.normal(k_h, (B, H), dtype=jnp.float32)
    score = jax.random.uniform(k_s, (B,), dtype=jnp.float32)

    # One-time parameter repack (out of the per-call hot path).
    wx, wh, bias = prepare_augru_params(w, u, bu, br, bh)

    out = augru_forward(x, score, ht, wx, wh, bias)
    out = jax.block_until_ready(out)

    ref = _reference(x, score, ht, w, u, bu, br, bh)
    assert out.shape == (B, H)
    max_err = float(jnp.max(jnp.abs(out - ref)))
    # bf16 MXU operands (f32 accumulation / gate math) -> loosened tolerance.
    assert jnp.allclose(out, ref, atol=5e-2, rtol=5e-2), (
        f"mismatch vs reference (max abs err {max_err})")

    print("KERNEL_OK")
</pallas_src>

<mosaic_0001>
module attributes {stable_mosaic.version = 11 : i64} {
  func.func @augru_kernel(%arg0: i32, %arg1: memref<16x16xf32, #tpu.memory_space<vmem>>, %arg2: memref<16x32xf32, #tpu.memory_space<vmem>>, %arg3: memref<16x1xf32, #tpu.memory_space<vmem>>, %arg4: memref<16x512xbf16, #tpu.memory_space<vmem>>, %arg5: memref<32x512xbf16, #tpu.memory_space<vmem>>, %arg6: memref<1x512xf32, #tpu.memory_space<vmem>>, %arg7: memref<16x32xf32, #tpu.memory_space<vmem>>) attributes {dimension_semantics = [#tpu.dimension_semantics<parallel>], iteration_bounds = array<i64: 1>, scalar_prefetch = 0 : i64, scratch_operands = 0 : i64, tpu.core_type = #tpu.core_type<tc>, window_params = [{transform_indices = @transform_0, window_bounds = array<i64: 16, 16>}, {transform_indices = @transform_1, window_bounds = array<i64: 16, 32>}, {transform_indices = @transform_2, window_bounds = array<i64: 16, 1>}, {pipeline_mode = #tpu.pipeline_mode<synchronous>, transform_indices = @transform_3, window_bounds = array<i64: 16, 512>}, {pipeline_mode = #tpu.pipeline_mode<synchronous>, transform_indices = @transform_4, window_bounds = array<i64: 32, 512>}, {pipeline_mode = #tpu.pipeline_mode<synchronous>, transform_indices = @transform_5, window_bounds = array<i64: 1, 512>}, {transform_indices = @transform_6, window_bounds = array<i64: 16, 32>}]} {
    %c0 = arith.constant 0 : index
    %c0_0 = arith.constant 0 : index
    %0 = vector.load %arg1[%c0, %c0_0] : memref<16x16xf32, #tpu.memory_space<vmem>>, vector<16x16xf32>
    %1 = arith.truncf %0 : vector<16x16xf32> to vector<16x16xbf16>
    %c0_1 = arith.constant 0 : index
    %c0_2 = arith.constant 0 : index
    %2 = vector.load %arg4[%c0_1, %c0_2] : memref<16x512xbf16, #tpu.memory_space<vmem>>, vector<16x512xbf16>
    %cst = arith.constant dense<0.000000e+00> : vector<16x512xf32>
    %3 = tpu.matmul %1, %2, %cst {dimension_numbers = #tpu.dot_dimension_numbers<[1], [0], [0], [1], [0, 0, 1, 1], [], []>} : vector<16x16xbf16>, vector<16x512xbf16>, vector<16x512xf32> -> vector<16x512xf32>
    %c0_3 = arith.constant 0 : index
    %c0_4 = arith.constant 0 : index
    %4 = vector.load %arg2[%c0_3, %c0_4] : memref<16x32xf32, #tpu.memory_space<vmem>>, vector<16x32xf32>
    %5 = arith.truncf %4 : vector<16x32xf32> to vector<16x32xbf16>
    %c0_5 = arith.constant 0 : index
    %c0_6 = arith.constant 0 : index
    %6 = vector.load %arg5[%c0_5, %c0_6] : memref<32x512xbf16, #tpu.memory_space<vmem>>, vector<32x512xbf16>
    %cst_7 = arith.constant dense<0.000000e+00> : vector<16x512xf32>
    %7 = tpu.matmul %5, %6, %cst_7 {dimension_numbers = #tpu.dot_dimension_numbers<[1], [0], [0], [1], [0, 0, 1, 1], [], []>} : vector<16x32xbf16>, vector<32x512xbf16>, vector<16x512xf32> -> vector<16x512xf32>
    %8 = arith.addf %3, %7 : vector<16x512xf32>
    %c0_8 = arith.constant 0 : index
    %c0_9 = arith.constant 0 : index
    %9 = vector.load %arg6[%c0_8, %c0_9] : memref<1x512xf32, #tpu.memory_space<vmem>>, vector<1x512xf32>
    %10 = vector.broadcast %9 : vector<1x512xf32> to vector<16x512xf32>
    %11 = arith.addf %8, %10 : vector<16x512xf32>
    %c0_10 = arith.constant 0 : index
    %c0_11 = arith.constant 0 : index
    %12 = vector.load %arg2[%c0_10, %c0_11] : memref<16x32xf32, #tpu.memory_space<vmem>>, vector<16x32xf32>
    %c0_12 = arith.constant 0 : index
    %c0_13 = arith.constant 0 : index
    %13 = vector.load %arg3[%c0_12, %c0_13] : memref<16x1xf32, #tpu.memory_space<vmem>>, vector<16x1xf32>
    %14 = vector.extract_strided_slice %11 {offsets = [0, 0], sizes = [16, 32], strides = [1, 1]} : vector<16x512xf32> to vector<16x32xf32>
    %15 = arith.negf %14 : vector<16x32xf32>
    %16 = math.exp %15 : vector<16x32xf32>
    %cst_14 = arith.constant 1.000000e+00 : f32
    %17 = vector.broadcast %cst_14 : f32 to vector<16x32xf32>
    %18 = arith.addf %17, %16 : vector<16x32xf32>
    %19 = arith.divf %17, %18 : vector<16x32xf32>
    %20 = vector.broadcast %13 : vector<16x1xf32> to vector<16x32xf32>
    %21 = arith.mulf %20, %19 : vector<16x32xf32>
    %22 = vector.extract_strided_slice %11 {offsets = [0, 128], sizes = [16, 32], strides = [1, 1]} : vector<16x512xf32> to vector<16x32xf32>
    %23 = arith.negf %22 : vector<16x32xf32>
    %24 = math.exp %23 : vector<16x32xf32>
    %cst_15 = arith.constant 1.000000e+00 : f32
    %25 = vector.broadcast %cst_15 : f32 to vector<16x32xf32>
    %26 = arith.addf %25, %24 : vector<16x32xf32>
    %27 = arith.divf %25, %26 : vector<16x32xf32>
    %28 = vector.extract_strided_slice %11 {offsets = [0, 256], sizes = [16, 32], strides = [1, 1]} : vector<16x512xf32> to vector<16x32xf32>
    %29 = vector.extract_strided_slice %11 {offsets = [0, 384], sizes = [16, 32], strides = [1, 1]} : vector<16x512xf32> to vector<16x32xf32>
    %30 = arith.mulf %27, %29 : vector<16x32xf32>
    %31 = arith.addf %28, %30 : vector<16x32xf32>
    %32 = math.tanh %31 : vector<16x32xf32>
    %33 = arith.subf %32, %12 : vector<16x32xf32>
    %34 = arith.mulf %21, %33 : vector<16x32xf32>
    %35 = arith.addf %12, %34 : vector<16x32xf32>
    %c0_16 = arith.constant 0 : index
    %c0_17 = arith.constant 0 : index
    %36 = vector.load %arg7[%c0_16, %c0_17] : memref<16x32xf32, #tpu.memory_space<vmem>>, vector<16x32xf32>
    tpu.vector_store %arg7[%c0_16, %c0_17], %35 {strides = array<i32>} : memref<16x32xf32, #tpu.memory_space<vmem>>, vector<16x32xf32>,
    return
  }
  func.func @transform_0(%arg0: i32) -> (i32, i32) {
    %c0_i32 = arith.constant 0 : i32
    %c0_i32_0 = arith.constant 0 : i32
    return %arg0, %c0_i32 : i32, i32
  }
  func.func @transform_1(%arg0: i32) -> (i32, i32) {
    %c0_i32 = arith.constant 0 : i32
    %c0_i32_0 = arith.constant 0 : i32
    return %arg0, %c0_i32 : i32, i32
  }
  func.func @transform_2(%arg0: i32) -> (i32, i32) {
    %c0_i32 = arith.constant 0 : i32
    %c0_i32_0 = arith.constant 0 : i32
    return %arg0, %c0_i32 : i32, i32
  }
  func.func @transform_3(%arg0: i32) -> (i32, i32) {
    %c0_i32 = arith.constant 0 : i32
    %c0_i32_0 = arith.constant 0 : i32
    %c0_i32_1 = arith.constant 0 : i32
    return %c0_i32, %c0_i32_0 : i32, i32
  }
  func.func @transform_4(%arg0: i32) -> (i32, i32) {
    %c0_i32 = arith.constant 0 : i32
    %c0_i32_0 = arith.constant 0 : i32
    %c0_i32_1 = arith.constant 0 : i32
    return %c0_i32, %c0_i32_0 : i32, i32
  }
  func.func @transform_5(%arg0: i32) -> (i32, i32) {
    %c0_i32 = arith.constant 0 : i32
    %c0_i32_0 = arith.constant 0 : i32
    %c0_i32_1 = arith.constant 0 : i32
    return %c0_i32, %c0_i32_0 : i32, i32
  }
  func.func @transform_6(%arg0: i32) -> (i32, i32) {
    %c0_i32 = arith.constant 0 : i32
    %c0_i32_0 = arith.constant 0 : i32
    return %arg0, %c0_i32 : i32, i32
  }
}

</mosaic_0001>

<bundles_post_ra>
// kernel: augru_forward.1
= control target key start
LH: loop header
LB: loop body
LE: loop exit
PB: predicated region body
PF: predicated region fallthrough
CT: control target
= control target key end

     0   :  { %11 = vsyncpa [#allocation3], 0  ;;  %s478_s21 = smov [#allocation2]   ;;  %s594_s0 = inlined_call_operand.vmem [shape: f32[16,16], index: 0, kind: input, shape index: {}]   ;;  %s595_s1 = inlined_call_operand.vmem [shape: f32[16,32], index: 1, kind: input, shape index: {}]   ;;  %s596_s2 = inlined_call_operand.vmem [shape: f32[16,1], index: 2, kind: input, shape index: {}]   ;;  %s597_s3 = inlined_call_operand.hbm [shape: bf16[16,512], index: 3, kind: input, shape index: {}]   ;;  %s598_s4 = inlined_call_operand.vmem [shape: bf16[32,512], index: 4, kind: input, shape index: {}]   ;;  %s599_s5 = inlined_call_operand.vmem [shape: f32[1,512], index: 5, kind: input, shape index: {}]   ;;  %s600_s6 = inlined_call_operand.vmem [shape: f32[16,32], index: 6, kind: output, shape index: {}]  }
   0x1   :  { %s23_s22 = sshll.u32 %s478_s21, 4  ;;  %s454_s25 = scalar_lea.hbm %s597_s3, 512  ;;  %s24_s22 = int_to_ptr.vmem [resolvable:$true] %s23_s22 }
   0x2   :  { %p455_p0 = scmp.ne.s32.totalorder %s597_s3, %s454_s25  ;;  %p458_p1 = scmp.lt.u32.totalorder %s454_s25, %s597_s3 }
   0x4   :  { %p460_p2 = pnand %p458_p1, %p455_p0 }
   0x6   :  { %463 = shalt.err (!%p460_p2)
}
   0x7   :  { %s464_s30 = scalar_lea.vmem %s24_s22, 512  ;;  %p469_p4 = scmp.lt.s32.totalorder %s24_s22, %s24_s22 }
   0x8   :  { %p465_p3 = scmp.ne.s32.totalorder %s24_s22, %s464_s30  ;;  %p470_p5 = scmp.lt.s32.totalorder %s464_s30, %s464_s30 }
   0xa   :  { %p471_p6 = por %p470_p5, %p469_p4 }
   0xc   :  { %p472_p7 = pnand %p471_p6, %p465_p3 }
   0xe   :  { %475 = shalt.err (!%p472_p7)
}
   0xf   :  { %s479_s7 = smov 256   ;;  %s480_s8 = smov 16  }
  0x10   :  { %29 = dma.hbm_to_vmem [thread:$0]  %s597_s3, 512, %s24_s22, [#allocation3], %s479_s7, %s479_s7, %s480_s8  }
  0x11   :  { %476 = dma.done.wait [#allocation3], 512  }
  0x12   :  { %477 = vsyncadd [#allocation3], 4294966784  ;;  %v481_v0 = vmov 0   ;;  %v416_v1 = vld [vmem:[%s598_s4 + $0x4] ss:$16 sps:$4 sm:$0xff]   ;;  %v549_v6 = vld [vmem:[%s595_s1 + $0x8] sm:$0xff]  ;;  %v298_v21 = vlaneseq }
  0x13   :  { %132 = vmatprep.mubr.bf16.mxu0 %v481_v0  ;;  %175 = vmatprep.mubr.bf16.mxu1 %v481_v0  ;;  %v418_v2 = vld [vmem:[%s598_s4] ss:$16 sps:$4 sm:$0xff]   ;;  %v419_v3 = vld [vmem:[%s598_s4 + $0x24] ss:$16 sps:$4 sm:$0xff]   ;;  %v425_v8 = vld [vmem:[%s598_s4 + $0xc] ss:$16 sps:$4 sm:$0xff]  }
  0x14   :  { %415 = vset.pattern.permute.xlu0 %v481_v0  ;;  %100 = vmatprep.subr.bf16.mxu0 %v416_v1  ;;  %v421_v4 = vld [vmem:[%s598_s4 + $0x20] ss:$16 sps:$4 sm:$0xff]   ;;  %v424_v7 = vld [vmem:[#allocation2 + $0x4] ss:$16 sps:$4 sm:$0xff]   ;;  %v427_v9 = vld [vmem:[%s598_s4 + $0x8] ss:$16 sps:$4 sm:$0xff]  }
  0x15   :  { %v544_v5 = vld [vmem:[%s595_s1] sm:$0xff]  ;;  %101 = vmatpush1.bf16.msra.mxu0 %v418_v2  ;;  %v428_v11 = vld [vmem:[%s598_s4 + $0x2c] ss:$16 sps:$4 sm:$0xff]   ;;  %vm96_vm0 = vcmask 261120   ;;  %143 = vmatprep.subr.bf16.mxu1 %v425_v8  ;;  %v430_v13 = vld [vmem:[%s598_s4 + $0x28] ss:$16 sps:$4 sm:$0xff]  }
  0x16   :  { %102 = vmatprep.subr.bf16.mxu0 %v419_v3  ;;  %v47_v10 = vpack.c.bf16 %v549_v6, %v544_v5  ;;  %v422_v12 = vld [vmem:[#allocation2] ss:$16 sps:$4 sm:$0xff]   ;;  %144 = vmatpush1.bf16.msra.mxu1 %v427_v9  ;;  %v433_v14 = vld [vmem:[#allocation2 + $0xc] ss:$16 sps:$4 sm:$0xff]   ;;  %v431_v17 = vld [vmem:[#allocation2 + $0x8] ss:$16 sps:$4 sm:$0xff]  }
  0x17   :  { %145 = vmatprep.subr.bf16.mxu1 %v428_v11  ;;  %v326_v15 = vld [vmem:[%s596_s2] sm:$0xff]  ;;  %v327_v16 = vld [vmem:[%s596_s2 + $0x8] sm:$0xff]  ;;  %vm206_vm1 = vcmask 130048   ;;  %v299_v22 = vshrl.u32 %v298_v21, 7 }
  0x18   :  { %342 = vperm.xlu0 %415, %v326_v15   ;;  %v38_v18 = vld [vmem:[%s594_s0] sm:$0xff]  ;;  %v39_v19 = vld [vmem:[%s594_s0 + $0x8] sm:$0xff] }
  0x19   :  { %103 = vmatpush1.bf16.msra.mxu0 %v421_v4  ;;  %v40_v20 = vpack.c.bf16 %v39_v19, %v38_v18  ;;  %v304_v23 = vsub.s32 1, %v299_v22  ;;  %v296_v24 = vld [vmem:[%s599_s5] sm:$0xf]  ;;  %v300_v26 = vsub.s32 0, %v299_v22  ;;  %v312_v48 = vsub.s32 3, %v299_v22 }
  0x1a   :  { %210 = vmatprep.subr.bf16.mxu0 %v424_v7  ;;  %146 = vmatpush1.bf16.msra.mxu1 %v430_v13  ;;  %v308_v49 = vsub.s32 2, %v299_v22 }
  0x1b   :  { %253 = vmatprep.subr.bf16.mxu1 %v433_v14  ;;  %v305_v25 = vrot.slane %v296_v24, %v304_v23  ;;  %v301_v31 = vrot.slane %v296_v24, %v300_v26  ;;  %v313_v50 = vrot.slane %v296_v24, %v312_v48 }
  0x1c   :  { %391 = vmatmul.mubr.msk.bf16.vlgmr.msra.gmra.mrb[0].mxu0 %vm96_vm0, %v47_v10  ;;  %347 = vperm.xlu0 %415, %v327_v16   ;;  %v309_v53 = vrot.slane %v296_v24, %v308_v49 }
  0x1d   :  { %211 = vmatpush1.bf16.msra.mxu0 %v422_v12  ;;  %242 = vmatprep.mubr.bf16.mxu0 %v481_v0 }
  0x1e   :  { %392 = vmatmul.mubr.msk.bf16.vlgmr.msra.gmra.mrb[0].mxu1 %vm96_vm0, %v47_v10 }
  0x1f   :  { %254 = vmatpush1.bf16.msra.mxu1 %v431_v17  ;;  %285 = vmatprep.mubr.bf16.mxu1 %v481_v0 }
  0x28   :  { %397 = vmatmul.mubr.msk.bf16.vlgmr.msra.gmra.mrb[0].mxu0 %vm206_vm1, %v40_v20 }
  0x2a   :  { %398 = vmatmul.mubr.msk.bf16.vlgmr.msra.gmra.mrb[0].mxu1 %vm206_vm1, %v40_v20 }
  0x97   :  { %v343_v2 = vpop.permute.xlu0 %342 }
  0x9b   :  { %v348_v8 = vpop.permute.xlu0 %347 }
  0xfb   :  { %v244_v27 = vpop.f32.mrb[0].mxu0 }
  0xfc   :  { %v246_v28 = vpop.f32.mrb[1].mxu0  ;;  %v318_v38 = vadd.f32 %v301_v31, %v244_v27 }
  0xfd   :  { %v319_v29 = vadd.f32 %v305_v25, %v246_v28  ;;  %v248_v30 = vpop.f32.mrb[2].mxu0  ;;  %v287_v35 = vpop.f32.mrb[0].mxu1 }
  0xfe   :  { %v250_v32 = vpop.f32.mrb[3].mxu0  ;;  %v289_v37 = vpop.f32.mrb[1].mxu1  ;;  %v322_v40 = vadd.f32 %v301_v31, %v248_v30  ;;  %v399_v42 = vmul.f32 -1.442695, %v318_v38  ;;  %v320_v58 = vadd.f32 %v309_v53, %v287_v35 }
  0xff   :  { %v401_v33 = vmul.f32 -1.442695, %v319_v29  ;;  %v323_v34 = vadd.f32 %v305_v25, %v250_v32  ;;  %v291_v39 = vpop.f32.mrb[2].mxu1  ;;  %v321_v55 = vadd.f32 %v313_v50, %v289_v37 }
 0x100   :  { %v293_v41 = vpop.f32.mrb[3].mxu1  ;;  %v400_v43 = vmul.f32 -1.442695, %v322_v40  ;;  %v324_v63 = vadd.f32 %v309_v53, %v291_v39 }
 0x101   :  { %434 = vpow2.f32 %v401_v33  ;;  %v402_v36 = vmul.f32 -1.442695, %v323_v34  ;;  %v325_v60 = vadd.f32 %v313_v50, %v293_v41 }
 0x103   :  { %436 = vpow2.f32 %v402_v36 }
 0x104   :  { %438 = vpow2.f32 %v399_v42 }
 0x105   :  { %440 = vpow2.f32 %v400_v43 }
 0x10b   :  { %v435_v44 = vpop.eup %434 }
 0x10c   :  { %v358_v45 = vadd.f32 1.0, %v435_v44 }
 0x10d   :  { %v437_v46 = vpop.eup %436 }
 0x10e   :  { %442 = vrcp.f32 %v358_v45  ;;  %v359_v47 = vadd.f32 1.0, %v437_v46  ;;  %v439_v51 = vpop.eup %438 }
 0x10f   :  { %v441_v52 = vpop.eup %440  ;;  %v334_v54 = vadd.f32 1.0, %v439_v51 }
 0x110   :  { %444 = vrcp.f32 %v359_v47  ;;  %v335_v57 = vadd.f32 1.0, %v441_v52 }
 0x111   :  { %446 = vrcp.f32 %v334_v54 }
 0x112   :  { %448 = vrcp.f32 %v335_v57 }
 0x118   :  { %v443_v56 = vpop.eup %442 }
 0x119   :  { %v364_v59 = vmul.f32 %v443_v56, %v321_v55 }
 0x11a   :  { %v445_v61 = vpop.eup %444 }
 0x11b   :  { %v366_v62 = vadd.f32 %v364_v59, %v320_v58  ;;  %v365_v0 = vmul.f32 %v445_v61, %v325_v60  ;;  %v447_v3 = vpop.eup %446 }
 0x11c   :  { %v449_v4 = vpop.eup %448  ;;  %v350_v9 = vmul.f32 %v447_v3, %v343_v2 }
 0x11d   :  { %450 = vtanh.f32 %v366_v62  ;;  %v367_v1 = vadd.f32 %v365_v0, %v324_v63  ;;  %v351_v13 = vmul.f32 %v449_v4, %v348_v8 }
 0x11f   :  { %452 = vtanh.f32 %v367_v1 }
 0x127   :  { %v451_v7 = vpop.eup %450 }
 0x128   :  { %v370_v10 = vsub.f32 %v451_v7, %v544_v5 }
 0x129   :  { %v453_v11 = vpop.eup %452 }
 0x12a   :  { %v372_v12 = vmul.f32 %v370_v10, %v350_v9  ;;  %v371_v14 = vsub.f32 %v453_v11, %v549_v6 }
 0x12c   :  { %v374_v15 = vadd.f32 %v372_v12, %v544_v5  ;;  %v373_v16 = vmul.f32 %v371_v14, %v351_v13 }
 0x12e   :  { %376 = vst.msk [vmem:[%s600_s6] sm:$0xff] %vm96_vm0, %v374_v15  ;;  %v375_v17 = vadd.f32 %v373_v16, %v549_v6 }
 0x130   :  { %377 = vst.msk [vmem:[%s600_s6 + $0x8] sm:$0xff] %vm96_vm0, %v375_v17 }
 0x131   :  { %382 = vsyncpa [#allocation3], 1 }

</bundles_post_ra>
